<compile_context>
chip_gen: v6e
topology: v6e:2x2x1
jax: 0.10.0
libtpu: 0.0.40
codegen_flags: <defaults>
</compile_context>

<pallas_src>
import functools

import jax
import jax.numpy as jnp
from jax import lax
from jax.experimental import pallas as pl
from jax.experimental.pallas import tpu as pltpu


LANE = 128                 # vreg lane width
SUBLANE = 8                # f32 vreg sublane count (accumulator shape)
CHUNK_ROWS = 256           # strip-mine unit inside a block (~32 f32 vregs)
TARGET_BLOCK_ROWS = 8192   # 8192 x 128 x 4B = 4 MiB f32 per input buffer
MIN_PALLAS_ELEMS = 1024    # below this a plain XLA reduce beats launch cost


def _round_up(x, m):
    return -(-x // m) * m


def _num_tensorcores():
    """2 TensorCores per chip on v7x; 1 on v5e/v6e."""
    try:
        kind = jax.devices()[0].device_kind.lower()
    except Exception:  # pragma: no cover - defensive
        return 1
    return 2 if "v7" in kind else 1


def _maxsquare_kernel(prob_ref, sumsq_out, cnt_out, *, ignore_index, valid_rows,
                      block_rows, chunk_rows, tiles_per_core):
    """Accumulates sum(prob^2) and count over the non-ignored elements.

    Grid = (cores, tiles_per_core).  Axis 0 splits the tile range across
    TensorCores (size 1 on single-TC parts); axis 1 is the 'arbitrary'
    reduction axis.  The (1, 8, 128) output blocks stay VMEM-resident across
    axis 1 and are the accumulators (no scratch, no finalize copy).
    """
    c = pl.program_id(0)   # core-parallel chunk
    i = pl.program_id(1)   # reduction step within this chunk

    @pl.when(i == 0)
    def _init():
        sumsq_out[0] = jnp.zeros((SUBLANE, LANE), jnp.float32)
        cnt_out[0] = jnp.zeros((SUBLANE, LANE), jnp.int32)

    tile_idx = c * tiles_per_core + i        # logical (un-clamped) tile id
    num_chunks = block_rows // chunk_rows
    groups = chunk_rows // SUBLANE

    def accumulate(use_row_mask):
        if use_row_mask:
            # Hoisted out of the chunk loop (JAX does not CSE broadcast_in_dim).
            base_iota = lax.broadcasted_iota(jnp.int32, (chunk_rows, LANE), 0)
            row_base = tile_idx * block_rows

        def body(j, carry):
            s_sum, s_cnt = carry
            start = pl.multiple_of(j * chunk_rows, chunk_rows)
            # Cast per-chunk on the VPU; the input stays native dtype in HBM.
            p = prob_ref[pl.ds(start, chunk_rows), :].astype(jnp.float32)
            valid = p != jnp.float32(ignore_index)
            if use_row_mask:
                # Masks out the rows past the logical end of the input and the
                # whole block when this is a clamped duplicate tile.
                row_ids = row_base + start + base_iota
                valid = jnp.logical_and(valid, row_ids < valid_rows)
            sq = jnp.where(valid, p * p, jnp.float32(0.0))
            # Fold the chunk onto one vreg-shaped carry: pure VALU adds.
            s_sum = s_sum + sq.reshape(groups, SUBLANE, LANE).sum(axis=0)
            s_cnt = s_cnt + valid.astype(jnp.int32).reshape(
                groups, SUBLANE, LANE).sum(axis=0)
            return s_sum, s_cnt

        init = (jnp.zeros((SUBLANE, LANE), jnp.float32),
                jnp.zeros((SUBLANE, LANE), jnp.int32))
        s_sum, s_cnt = lax.fori_loop(0, num_chunks, body, init,
                                     unroll=min(2, num_chunks))
        sumsq_out[0] += s_sum
        cnt_out[0] += s_cnt

    # Interior tiles take the unmasked fast path; the row-id masked path only
    # runs for the partial last tile / a clamped duplicate tile.
    needs_row_mask = (tile_idx + 1) * block_rows > valid_rows

    @pl.when(jnp.logical_not(needs_row_mask))
    def _fast():
        accumulate(False)

    @pl.when(needs_row_mask)
    def _masked():
        accumulate(True)


def max_square_loss(pred, prob, ignore_index=-1):
    """Pallas implementation of MaxSquareloss.forward(pred, prob)."""
    del pred  # unused, exactly as in the PyTorch module

    flat = prob.reshape(-1)                  # free reshape, native dtype
    n = flat.shape[0]

    def _plain(x):
        mask = x != ignore_index
        xf = x.astype(jnp.float32)
        return (jnp.sum(jnp.where(mask, xf * xf, jnp.float32(0.0))),
                jnp.sum(mask).astype(jnp.int32))

    if n == 0:
        # 0/0 -> NaN, matching the PyTorch reference for an empty mask.
        return jnp.float32(0.0) / jnp.float32(0.0)

    # <128-element tail is reduced in the JAX epilogue instead of building a
    # padded copy of prob in HBM (the common n % 128 == 0 case is zero-copy).
    rem = n % LANE
    main = n - rem

    if main < MIN_PALLAS_ELEMS:
        # Tiny-input fallback: kernel launch / pipeline prologue would dominate.
        total_sq, total_cnt = _plain(flat)
        return -(total_sq / total_cnt.astype(jnp.float32)) * jnp.float32(0.5)

    rows = main // LANE
    mat = flat.reshape(rows, LANE) if rem == 0 else flat[:main].reshape(rows, LANE)

    # dtype-aware native sublane packing: 8 rows (f32), 16 (bf16), 32 (int8).
    itemsize = jnp.dtype(prob.dtype).itemsize
    sublane_pack = max(SUBLANE, 32 // max(itemsize, 1))

    if rows <= CHUNK_ROWS:
        block_rows = _round_up(rows, sublane_pack)   # shrink-to-fit, 1 chunk
        chunk_rows = block_rows
    else:
        block_rows = min(TARGET_BLOCK_ROWS, _round_up(rows, CHUNK_ROWS))
        chunk_rows = CHUNK_ROWS

    num_tiles = -(-rows // block_rows)
    # 2-way row split only on multi-TensorCore parts (v7x); 1-D otherwise so
    # single-TC chips never pay for a duplicated clamped block.
    ncores = 2 if (num_tiles >= 2 and _num_tensorcores() >= 2) else 1
    tiles_per_core = -(-num_tiles // ncores)

    kernel = functools.partial(
        _maxsquare_kernel,
        ignore_index=float(ignore_index),
        valid_rows=rows,
        block_rows=block_rows,
        chunk_rows=chunk_rows,
        tiles_per_core=tiles_per_core,
    )

    def in_index_map(c, i):
        # Clamp so a trailing odd tile on the second core never DMAs out of
        # bounds; the duplicated block is zeroed in-kernel via the row-id mask.
        return (jnp.minimum(c * tiles_per_core + i, num_tiles - 1), 0)

    # TODO(synk): on v7x, consider pltpu.CORE_PARALLEL for axis 0 and
    # pipeline_mode=pl.Buffered(3) on the input spec once verified on hardware.
    sumsq_part, cnt_part = pl.pallas_call(
        kernel,
        out_shape=(
            jax.ShapeDtypeStruct((ncores, SUBLANE, LANE), jnp.float32),
            jax.ShapeDtypeStruct((ncores, SUBLANE, LANE), jnp.int32),
        ),
        grid_spec=pltpu.PrefetchScalarGridSpec(
            num_scalar_prefetch=0,
            grid=(ncores, tiles_per_core),
            in_specs=[pl.BlockSpec((block_rows, LANE), in_index_map)],
            out_specs=(
                pl.BlockSpec((1, SUBLANE, LANE), lambda c, i: (c, 0, 0)),
                pl.BlockSpec((1, SUBLANE, LANE), lambda c, i: (c, 0, 0)),
            ),
        ),
        compiler_params=pltpu.CompilerParams(
            dimension_semantics=("parallel", "arbitrary"),
        ),
    )(mat)

    # Tiny epilogue: single cross-lane reduction + scalar math.
    total_sq = jnp.sum(sumsq_part)
    total_cnt = jnp.sum(cnt_part)

    if rem:
        tail_sq, tail_cnt = _plain(flat[main:])
        total_sq = total_sq + tail_sq
        total_cnt = total_cnt + tail_cnt

    return -(total_sq / total_cnt.astype(jnp.float32)) * jnp.float32(0.5)


def _reference(pred, prob, ignore_index=-1):
    """Plain-JAX reference mirroring the PyTorch forward."""
    del pred
    mask = prob != ignore_index
    sq = jnp.where(mask, prob * prob, 0.0)
    return -(jnp.sum(sq) / jnp.sum(mask)) / 2.0


if __name__ == "__main__":
    key = jax.random.PRNGKey(0)
    k1, k2 = jax.random.split(key)

    N, C, H, W = 2, 4, 16, 16  # small demo shapes consistent with (N, C, H, W)
    pred = jax.random.normal(k1, (N, C, H, W), dtype=jnp.float32)
    prob = jax.nn.softmax(pred, axis=1)
    ignore_index = -1
    ignore_mask = jax.random.bernoulli(k2, p=0.1, shape=(N, C, H, W))
    prob = jnp.where(ignore_mask, jnp.float32(ignore_index), prob)

    loss = max_square_loss(pred, prob, ignore_index=ignore_index)
    loss = jax.block_until_ready(loss)

    ref = _reference(pred, prob, ignore_index=ignore_index)
    assert jnp.allclose(loss, ref, rtol=1e-5, atol=1e-6), (loss, ref)

    print("KERNEL_OK")
</pallas_src>

<mosaic_0001>
module attributes {stable_mosaic.version = 11 : i64} {
  func.func @_maxsquare_kernel(%arg0: i32, %arg1: i32, %arg2: memref<16x128xf32, #tpu.memory_space<vmem>>, %arg3: memref<1x8x128xf32, #tpu.memory_space<vmem>>, %arg4: memref<1x8x128xi32, #tpu.memory_space<vmem>>) attributes {dimension_semantics = [#tpu.dimension_semantics<parallel>, #tpu.dimension_semantics<arbitrary>], iteration_bounds = array<i64: 1, 1>, scalar_prefetch = 0 : i64, scratch_operands = 0 : i64, tpu.core_type = #tpu.core_type<tc>, window_params = [{transform_indices = @transform_0, window_bounds = array<i64: 16, 128>}, {transform_indices = @transform_1, window_bounds = array<i64: 1, 8, 128>}, {transform_indices = @transform_2, window_bounds = array<i64: 1, 8, 128>}]} {
    %c0_i32 = arith.constant 0 : i32
    %0 = arith.cmpi eq, %arg1, %c0_i32 : i32
    %1 = arith.extui %0 : i1 to i32
    %c0_i32_0 = arith.constant 0 : i32
    %2 = arith.cmpi ne, %1, %c0_i32_0 : i32
    scf.if %2 {
      %cst = arith.constant 0.000000e+00 : f32
      %13 = vector.broadcast %cst : f32 to vector<8x128xf32>
      %c0 = arith.constant 0 : index
      %c0_5 = arith.constant 0 : index
      %c0_6 = arith.constant 0 : index
      %14 = vector.load %arg3[%c0, %c0_5, %c0_6] : memref<1x8x128xf32, #tpu.memory_space<vmem>>, vector<1x8x128xf32>
      %15 = vector.shape_cast %14 : vector<1x8x128xf32> to vector<8x128xf32>
      %16 = vector.shape_cast %13 : vector<8x128xf32> to vector<1x8x128xf32>
      tpu.vector_store %arg3[%c0, %c0_5, %c0_6], %16 {strides = array<i32>} : memref<1x8x128xf32, #tpu.memory_space<vmem>>, vector<1x8x128xf32>,
      %c0_i32_7 = arith.constant 0 : i32
      %17 = vector.broadcast %c0_i32_7 : i32 to vector<8x128xi32>
      %c0_8 = arith.constant 0 : index
      %c0_9 = arith.constant 0 : index
      %c0_10 = arith.constant 0 : index
      %18 = vector.load %arg4[%c0_8, %c0_9, %c0_10] : memref<1x8x128xi32, #tpu.memory_space<vmem>>, vector<1x8x128xi32>
      %19 = vector.shape_cast %18 : vector<1x8x128xi32> to vector<8x128xi32>
      %20 = vector.shape_cast %17 : vector<8x128xi32> to vector<1x8x128xi32>
      tpu.vector_store %arg4[%c0_8, %c0_9, %c0_10], %20 {strides = array<i32>} : memref<1x8x128xi32, #tpu.memory_space<vmem>>, vector<1x8x128xi32>,
    } else {
    }
    %c1_i32 = arith.constant 1 : i32
    %3 = arith.muli %arg0, %c1_i32 : i32
    %4 = arith.addi %3, %arg1 : i32
    %c1_i32_1 = arith.constant 1 : i32
    %5 = arith.addi %4, %c1_i32_1 : i32
    %c16_i32 = arith.constant 16 : i32
    %6 = arith.muli %5, %c16_i32 : i32
    %c16_i32_2 = arith.constant 16 : i32
    %7 = arith.cmpi sgt, %6, %c16_i32_2 : i32
    %true = arith.constant true
    %8 = arith.xori %7, %true : i1
    %9 = arith.extui %8 : i1 to i32
    %c0_i32_3 = arith.constant 0 : i32
    %10 = arith.cmpi ne, %9, %c0_i32_3 : i32
    scf.if %10 {
      %cst = arith.constant 0.000000e+00 : f32
      %13 = vector.broadcast %cst : f32 to vector<8x128xf32>
      %c0_i32_5 = arith.constant 0 : i32
      %14 = vector.broadcast %c0_i32_5 : i32 to vector<8x128xi32>
      %c0_i32_6 = arith.constant 0 : i32
      %c16_i32_7 = arith.constant 16 : i32
      %15 = arith.muli %c0_i32_6, %c16_i32_7 : i32
      %16 = tpu.assume_multiple %15, 16 : i32
      %17 = arith.index_cast %16 : i32 to index
      %c0 = arith.constant 0 : index
      %18 = vector.load %arg2[%17, %c0] : memref<16x128xf32, #tpu.memory_space<vmem>>, vector<16x128xf32>
      %cst_8 = arith.constant -1.000000e+00 : f32
      %19 = vector.broadcast %cst_8 : f32 to vector<16x128xf32>
      %20 = arith.cmpf one, %18, %19 : vector<16x128xf32>
      %21 = arith.mulf %18, %18 : vector<16x128xf32>
      %cst_9 = arith.constant 0.000000e+00 : f32
      %22 = vector.broadcast %cst_9 : f32 to vector<16x128xf32>
      %23 = arith.select %20, %21, %22 : vector<16x128xi1>, vector<16x128xf32>
      %24 = vector.shape_cast %23 : vector<16x128xf32> to vector<2x8x128xf32>
      %cst_10 = arith.constant dense<0.000000e+00> : vector<8x128xf32>
      %25 = vector.multi_reduction <add>, %24, %cst_10 [0] : vector<2x8x128xf32> to vector<8x128xf32>
      %26 = arith.addf %13, %25 : vector<8x128xf32>
      %27 = arith.extui %20 : vector<16x128xi1> to vector<16x128xi32>
      %28 = vector.shape_cast %27 : vector<16x128xi32> to vector<2x8x128xi32>
      %cst_11 = arith.constant dense<0> : vector<8x128xi32>
      %29 = vector.multi_reduction <add>, %28, %cst_11 [0] : vector<2x8x128xi32> to vector<8x128xi32>
      %30 = arith.addi %14, %29 : vector<8x128xi32>
      %c1_i32_12 = arith.constant 1 : i32
      %c0_13 = arith.constant 0 : index
      %c0_14 = arith.constant 0 : index
      %c0_15 = arith.constant 0 : index
      %31 = vector.load %arg3[%c0_13, %c0_14, %c0_15] : memref<1x8x128xf32, #tpu.memory_space<vmem>>, vector<1x8x128xf32>
      %32 = vector.shape_cast %31 : vector<1x8x128xf32> to vector<8x128xf32>
      %33 = arith.addf %32, %26 : vector<8x128xf32>
      %c0_16 = arith.constant 0 : index
      %c0_17 = arith.constant 0 : index
      %c0_18 = arith.constant 0 : index
      %34 = vector.load %arg3[%c0_16, %c0_17, %c0_18] : memref<1x8x128xf32, #tpu.memory_space<vmem>>, vector<1x8x128xf32>
      %35 = vector.shape_cast %34 : vector<1x8x128xf32> to vector<8x128xf32>
      %36 = vector.shape_cast %33 : vector<8x128xf32> to vector<1x8x128xf32>
      tpu.vector_store %arg3[%c0_16, %c0_17, %c0_18], %36 {strides = array<i32>} : memref<1x8x128xf32, #tpu.memory_space<vmem>>, vector<1x8x128xf32>,
      %c0_19 = arith.constant 0 : index
      %c0_20 = arith.constant 0 : index
      %c0_21 = arith.constant 0 : index
      %37 = vector.load %arg4[%c0_19, %c0_20, %c0_21] : memref<1x8x128xi32, #tpu.memory_space<vmem>>, vector<1x8x128xi32>
      %38 = vector.shape_cast %37 : vector<1x8x128xi32> to vector<8x128xi32>
      %39 = arith.addi %38, %30 : vector<8x128xi32>
      %c0_22 = arith.constant 0 : index
      %c0_23 = arith.constant 0 : index
      %c0_24 = arith.constant 0 : index
      %40 = vector.load %arg4[%c0_22, %c0_23, %c0_24] : memref<1x8x128xi32, #tpu.memory_space<vmem>>, vector<1x8x128xi32>
      %41 = vector.shape_cast %40 : vector<1x8x128xi32> to vector<8x128xi32>
      %42 = vector.shape_cast %39 : vector<8x128xi32> to vector<1x8x128xi32>
      tpu.vector_store %arg4[%c0_22, %c0_23, %c0_24], %42 {strides = array<i32>} : memref<1x8x128xi32, #tpu.memory_space<vmem>>, vector<1x8x128xi32>,
    } else {
    }
    %11 = arith.extui %7 : i1 to i32
    %c0_i32_4 = arith.constant 0 : i32
    %12 = arith.cmpi ne, %11, %c0_i32_4 : i32
    scf.if %12 {
      %13 = tpu.iota {dimensions = array<i32: 0>} : vector<16x128xi32>
      %c16_i32_5 = arith.constant 16 : i32
      %14 = arith.muli %4, %c16_i32_5 : i32
      %cst = arith.constant 0.000000e+00 : f32
      %15 = vector.broadcast %cst : f32 to vector<8x128xf32>
      %c0_i32_6 = arith.constant 0 : i32
      %16 = vector.broadcast %c0_i32_6 : i32 to vector<8x128xi32>
      %c0_i32_7 = arith.constant 0 : i32
      %c16_i32_8 = arith.constant 16 : i32
      %17 = arith.muli %c0_i32_7, %c16_i32_8 : i32
      %18 = tpu.assume_multiple %17, 16 : i32
      %19 = arith.index_cast %18 : i32 to index
      %c0 = arith.constant 0 : index
      %20 = vector.load %arg2[%19, %c0] : memref<16x128xf32, #tpu.memory_space<vmem>>, vector<16x128xf32>
      %cst_9 = arith.constant -1.000000e+00 : f32
      %21 = vector.broadcast %cst_9 : f32 to vector<16x128xf32>
      %22 = arith.cmpf one, %20, %21 : vector<16x128xf32>
      %23 = arith.addi %14, %18 : i32
      %24 = vector.broadcast %23 : i32 to vector<16x128xi32>
      %25 = arith.addi %24, %13 : vector<16x128xi32>
      %c16_i32_10 = arith.constant 16 : i32
      %26 = vector.broadcast %c16_i32_10 : i32 to vector<16x128xi32>
      %27 = arith.cmpi slt, %25, %26 : vector<16x128xi32>
      %28 = arith.andi %22, %27 : vector<16x128xi1>
      %29 = arith.mulf %20, %20 : vector<16x128xf32>
      %cst_11 = arith.constant 0.000000e+00 : f32
      %30 = vector.broadcast %cst_11 : f32 to vector<16x128xf32>
      %31 = arith.select %28, %29, %30 : vector<16x128xi1>, vector<16x128xf32>
      %32 = vector.shape_cast %31 : vector<16x128xf32> to vector<2x8x128xf32>
      %cst_12 = arith.constant dense<0.000000e+00> : vector<8x128xf32>
      %33 = vector.multi_reduction <add>, %32, %cst_12 [0] : vector<2x8x128xf32> to vector<8x128xf32>
      %34 = arith.addf %15, %33 : vector<8x128xf32>
      %35 = arith.extui %28 : vector<16x128xi1> to vector<16x128xi32>
      %36 = vector.shape_cast %35 : vector<16x128xi32> to vector<2x8x128xi32>
      %cst_13 = arith.constant dense<0> : vector<8x128xi32>
      %37 = vector.multi_reduction <add>, %36, %cst_13 [0] : vector<2x8x128xi32> to vector<8x128xi32>
      %38 = arith.addi %16, %37 : vector<8x128xi32>
      %c1_i32_14 = arith.constant 1 : i32
      %c0_15 = arith.constant 0 : index
      %c0_16 = arith.constant 0 : index
      %c0_17 = arith.constant 0 : index
      %39 = vector.load %arg3[%c0_15, %c0_16, %c0_17] : memref<1x8x128xf32, #tpu.memory_space<vmem>>, vector<1x8x128xf32>
      %40 = vector.shape_cast %39 : vector<1x8x128xf32> to vector<8x128xf32>
      %41 = arith.addf %40, %34 : vector<8x128xf32>
      %c0_18 = arith.constant 0 : index
      %c0_19 = arith.constant 0 : index
      %c0_20 = arith.constant 0 : index
      %42 = vector.load %arg3[%c0_18, %c0_19, %c0_20] : memref<1x8x128xf32, #tpu.memory_space<vmem>>, vector<1x8x128xf32>
      %43 = vector.shape_cast %42 : vector<1x8x128xf32> to vector<8x128xf32>
      %44 = vector.shape_cast %41 : vector<8x128xf32> to vector<1x8x128xf32>
      tpu.vector_store %arg3[%c0_18, %c0_19, %c0_20], %44 {strides = array<i32>} : memref<1x8x128xf32, #tpu.memory_space<vmem>>, vector<1x8x128xf32>,
      %c0_21 = arith.constant 0 : index
      %c0_22 = arith.constant 0 : index
      %c0_23 = arith.constant 0 : index
      %45 = vector.load %arg4[%c0_21, %c0_22, %c0_23] : memref<1x8x128xi32, #tpu.memory_space<vmem>>, vector<1x8x128xi32>
      %46 = vector.shape_cast %45 : vector<1x8x128xi32> to vector<8x128xi32>
      %47 = arith.addi %46, %38 : vector<8x128xi32>
      %c0_24 = arith.constant 0 : index
      %c0_25 = arith.constant 0 : index
      %c0_26 = arith.constant 0 : index
      %48 = vector.load %arg4[%c0_24, %c0_25, %c0_26] : memref<1x8x128xi32, #tpu.memory_space<vmem>>, vector<1x8x128xi32>
      %49 = vector.shape_cast %48 : vector<1x8x128xi32> to vector<8x128xi32>
      %50 = vector.shape_cast %47 : vector<8x128xi32> to vector<1x8x128xi32>
      tpu.vector_store %arg4[%c0_24, %c0_25, %c0_26], %50 {strides = array<i32>} : memref<1x8x128xi32, #tpu.memory_space<vmem>>, vector<1x8x128xi32>,
    } else {
    }
    return
  }
  func.func @transform_0(%arg0: i32, %arg1: i32) -> (i32, i32) {
    %c1_i32 = arith.constant 1 : i32
    %0 = arith.muli %arg0, %c1_i32 : i32
    %1 = arith.addi %0, %arg1 : i32
    %c0_i32 = arith.constant 0 : i32
    %2 = arith.minsi %1, %c0_i32 : i32
    %c0_i32_0 = arith.constant 0 : i32
    %c0_i32_1 = arith.constant 0 : i32
    return %2, %c0_i32_0 : i32, i32
  }
  func.func @transform_1(%arg0: i32, %arg1: i32) -> (i32, i32, i32) {
    %c0_i32 = arith.constant 0 : i32
    %c0_i32_0 = arith.constant 0 : i32
    %c0_i32_1 = arith.constant 0 : i32
    return %arg0, %c0_i32, %c0_i32_0 : i32, i32, i32
  }
  func.func @transform_2(%arg0: i32, %arg1: i32) -> (i32, i32, i32) {
    %c0_i32 = arith.constant 0 : i32
    %c0_i32_0 = arith.constant 0 : i32
    %c0_i32_1 = arith.constant 0 : i32
    return %arg0, %c0_i32, %c0_i32_0 : i32, i32, i32
  }
}

</mosaic_0001>

<bundles_post_ra>
// kernel: tpu_custom_call.1
= control target key start
LH: loop header
LB: loop body
LE: loop exit
PB: predicated region body
PF: predicated region fallthrough
CT: control target
= control target key end

     0   :  { %8 = vsyncpa [#allocation3], 0  ;;  %s237_s0 = inlined_call_operand.hbm [shape: f32[16,128], index: 0, kind: input, shape index: {}]   ;;  %s238_s1 = inlined_call_operand.hbm [shape: f32[1,8,128], index: 1, kind: output, shape index: {0}]   ;;  %s239_s2 = inlined_call_operand.hbm [shape: s32[1,8,128], index: 2, kind: output, shape index: {1}]  }
   0x1   :  { %9 = vsyncpa [#allocation4], 0 }
   0x2   :  { %10 = vsyncpa [#allocation7], 0  ;;  %s207_s9 = smov [#allocation2]  }
   0x3   :  { %s22_s10 = sshll.u32 %s207_s9, 4  ;;  %s23_s10 = int_to_ptr.vmem [resolvable:$true] %s22_s10 }
   0x4   :  { %s149_s11 = scalar_lea.vmem %s23_s10, 256  ;;  %p154_p1 = scmp.lt.s32.totalorder %s23_s10, %s23_s10 }
   0x5   :  { %p150_p0 = scmp.ne.s32.totalorder %s23_s10, %s149_s11  ;;  %p155_p2 = scmp.lt.s32.totalorder %s149_s11, %s149_s11 }
   0x7   :  { %p156_p3 = por %p155_p2, %p154_p1 }
   0x9   :  { %p157_p4 = pnand %p156_p3, %p150_p0 }
   0xb   :  { %160 = shalt.err (!%p157_p4)
}
   0xc   :  { %s208_s12 = smov 128   ;;  %s209_s13 = smov 8  }
   0xd   :  { %28 = dma.hbm_to_vmem [thread:$0]  %s237_s0, 256, %s23_s10, [#allocation3], %s208_s12, %s208_s12, %s209_s13  }
   0xe   :  { %201 = dma.done.wait [#allocation3], 256  }
   0xf   :  { %202 = vsyncadd [#allocation3], 4294967040  ;;  %v50_v0 = vld [vmem:[#allocation2] sm:$0xff]  ;;  %v51_v1 = vld [vmem:[#allocation2 + $0x8] sm:$0xff]  ;;  %v210_v4 = vmov 0   ;;  %s211_s16 = smov [#allocation6]  }
  0x10   :  { %vm52_vm0 = vcmp.ne.f32.partialorder %v50_v0, -1.0  ;;  %vm53_vm1 = vcmp.ne.f32.partialorder %v51_v1, -1.0  ;;  %v54_v2 = vmul.f32 %v50_v0, %v50_v0  ;;  %v55_v3 = vmul.f32 %v51_v1, %v51_v1  ;;  %s119_s17 = sshll.u32 %s211_s16, 4  ;;  %s212_s18 = smov [#allocation5]   ;;  %s120_s17 = int_to_ptr.vmem [resolvable:$true] %s119_s17 }
  0x11   :  { %v60_v5 = vsel %vm52_vm0, 1, %v210_v4  ;;  %v61_v6 = vsel %vm53_vm1, 1, %v210_v4  ;;  %s109_s19 = sshll.u32 %s212_s18, 4  ;;  %s161_s0 = scalar_lea.vmem %s120_s17, 128  ;;  %s110_s19 = int_to_ptr.vmem [resolvable:$true] %s109_s19 }
  0x12   :  { %v56_v7 = vsel %vm52_vm0, %v54_v2, 0.0  ;;  %v57_v8 = vsel %vm53_vm1, %v55_v3, 0.0  ;;  %v62_v9 = vadd.s32 %v61_v6, %v60_v5  ;;  %p162_p5 = scmp.ne.s32.totalorder %s120_s17, %s161_s0  ;;  %p166_p6 = scmp.lt.s32.totalorder %s120_s17, %s120_s17 }
  0x13   :  { %v58_v10 = vadd.f32 %v57_v8, %v56_v7  ;;  %p167_p7 = scmp.lt.s32.totalorder %s161_s0, %s161_s0 }
  0x14   :  { %68 = vst [vmem:[#allocation6] sm:$0xff] %v62_v9 }
  0x15   :  { %65 = vst [vmem:[#allocation5] sm:$0xff] %v58_v10  ;;  %p168_p8 = por %p167_p7, %p166_p6 }
  0x17   :  { %p169_p9 = pnand %p168_p8, %p162_p5 }
  0x19   :  { %172 = shalt.err (!%p169_p9)
}
  0x1a   :  { %122 = dma.vmem_to_hbm [thread:$0]  %s120_s17, 128, %s239_s2, [#allocation7]  }
  0x1b   :  { %s181_s22 = scalar_lea.vmem %s110_s19, 128  ;;  %p186_p11 = scmp.lt.s32.totalorder %s110_s19, %s110_s19 }
  0x1c   :  { %p182_p10 = scmp.ne.s32.totalorder %s110_s19, %s181_s22  ;;  %p187_p12 = scmp.lt.s32.totalorder %s181_s22, %s181_s22 }
  0x1e   :  { %p188_p13 = por %p187_p12, %p186_p11 }
  0x20   :  { %p189_p0 = pnand %p188_p13, %p182_p10 }
  0x22   :  { %192 = shalt.err (!%p189_p0)
}
  0x23   :  { %112 = dma.vmem_to_hbm [thread:$0]  %s110_s19, 128, %s238_s1, [#allocation4]  }
  0x24   :  { %203 = dma.done.wait [#allocation4], 128  }
  0x25   :  { %204 = vsyncadd [#allocation4], 4294967168 }
  0x26   :  { %205 = dma.done.wait [#allocation7], 128  }
  0x27   :  { %206 = vsyncadd [#allocation7], 4294967168 }
  0x28   :  { %129 = vsyncpa [#allocation3], 1 }
  0x29   :  { %130 = vsyncpa [#allocation4], 1 }
  0x2a   :  { %131 = vsyncpa [#allocation7], 1 }

</bundles_post_ra>
